<compile_context>
chip_gen: v7x
topology: tpu7x:2x2x1
jax: 0.10.0
libtpu: 0.0.40
codegen_flags: <defaults>
</compile_context>

<pallas_src>
import jax
import jax.numpy as jnp
from jax.experimental import pallas as pl
from jax.experimental.pallas import tpu as pltpu

LANE = 128     # TPU lane width.
HIDDEN = 64    # per-net hidden width from the module (fc1/fc2 = 64).

# v5e's default scoped-VMEM limit is 16 MiB; only emit an explicit
# vmem_limit_bytes when the estimated footprint would exceed this margin.
_V5E_SAFE_VMEM_BYTES = 12 * 1024 * 1024


def _round_up(n, m):
    return ((n + m - 1) // m) * m


# ----------------------------------------------------------------------------
# Kernel
# ----------------------------------------------------------------------------
def _mlp_kernel(x_ref, w1_ref, w2_ref, w3_ref, o_ref):
    """relu(relu(x @ W1) @ W2) @ W3 for one (TILE_B, .) batch tile.

    x is cast to the weights' compute dtype in-kernel, so the wrapper never
    materialises a casted copy of x in HBM.
    """
    x = x_ref[...].astype(w1_ref.dtype)
    h1 = jnp.maximum(
        jnp.dot(x, w1_ref[...], preferred_element_type=jnp.float32), 0.0
    ).astype(w2_ref.dtype)
    h2 = jnp.maximum(
        jnp.dot(h1, w2_ref[...], preferred_element_type=jnp.float32), 0.0
    ).astype(w3_ref.dtype)
    q = jnp.dot(h2, w3_ref[...], preferred_element_type=jnp.float32)
    o_ref[...] = q.astype(o_ref.dtype)


def _mlp_pallas(x, w1, w2, w3, *, tile_b=2048, out_dtype=None, flops=None):
    """Gridded fused 3-layer MLP.

    Batch is tiled; the tiny weights use full-extent blocks with
    index_map -> (0, 0) so they stay VMEM-resident across all grid steps
    (DMA'd once per call).  The compute dtype is the (pre-cast) weight dtype.
    """
    B, initus = x.shape
    h1_dim = w1.shape[1]
    h2_dim = w2.shape[1]
    out_dim = w3.shape[1]
    if out_dtype is None:
        out_dtype = w3.dtype

    # Sublane alignment: bf16 packs 16 rows per vreg, f32 packs 8.
    align = 16 if (jnp.dtype(w1.dtype).itemsize == 2 and B >= 16) else 8
    tile_b = max(align, min(int(tile_b), _round_up(B, align)))
    # Guarantee >= 2 grid steps when the batch allows it, so the "parallel"
    # axis actually shards across v7x's two TensorCores.
    if B > 2 * align:
        tile_b = min(tile_b, _round_up(pl.cdiv(B, 2), align))
    tile_b = _round_up(tile_b, align)
    grid_b = pl.cdiv(B, tile_b)

    if flops is None:
        flops = 2 * B * (initus * h1_dim + h1_dim * h2_dim + h2_dim * out_dim)
    w_bytes = sum(int(w.size) * w.dtype.itemsize for w in (w1, w2, w3))
    bytes_accessed = (
        int(x.size) * x.dtype.itemsize
        + w_bytes
        + B * out_dim * jnp.dtype(out_dtype).itemsize
    )

    # Scoped-VMEM estimate: double-buffered x/out tiles, resident weights
    # (double-buffered by default), and f32 intermediates.
    vmem_est = (
        2 * tile_b * initus * x.dtype.itemsize
        + 2 * w_bytes
        + 2 * tile_b * out_dim * jnp.dtype(out_dtype).itemsize
        + 4 * tile_b * (h1_dim + h2_dim + out_dim)
    )
    compiler_kwargs = dict(dimension_semantics=("parallel",))
    if vmem_est > _V5E_SAFE_VMEM_BYTES:
        # Only needed for very large user-chosen tiles (v5e default = 16 MiB).
        compiler_kwargs["vmem_limit_bytes"] = int(vmem_est * 3 // 2) + (4 << 20)

    out = pl.pallas_call(
        _mlp_kernel,
        out_shape=jax.ShapeDtypeStruct((B, out_dim), out_dtype),
        grid_spec=pltpu.PrefetchScalarGridSpec(
            num_scalar_prefetch=0,
            grid=(grid_b,),
            in_specs=[
                pl.BlockSpec((tile_b, initus), lambda i: (i, 0)),
                # NOTE: weights keep default double-buffering; pl.Buffered(1)
                # would save ~70 KiB of VMEM but is not worth the lowering
                # risk at this size.
                pl.BlockSpec((initus, h1_dim), lambda i: (0, 0)),   # resident
                pl.BlockSpec((h1_dim, h2_dim), lambda i: (0, 0)),   # resident
                pl.BlockSpec((h2_dim, out_dim), lambda i: (0, 0)),  # resident
            ],
            out_specs=pl.BlockSpec((tile_b, out_dim), lambda i: (i, 0)),
        ),
        compiler_params=pltpu.CompilerParams(**compiler_kwargs),
        cost_estimate=pl.CostEstimate(
            flops=int(flops), transcendentals=0,
            bytes_accessed=int(bytes_accessed)),
    )(x, w1, w2, w3)
    return out


# ----------------------------------------------------------------------------
# Weight packing (run ONCE per weight update, not per forward call)
# ----------------------------------------------------------------------------
def pack_single_weights(w1, w2, w3, *, compute_dtype=jnp.bfloat16):
    """Cast + lane-pad fc3 to a multiple of 128 so the output slab is
    lane-dense (unmasked stores).  Zero columns cost nothing on the MXU."""
    exitus = w3.shape[1]
    out_w = _round_up(exitus, LANE)
    w3p = jnp.zeros((w3.shape[0], out_w), compute_dtype)
    w3p = w3p.at[:, :exitus].set(w3.astype(compute_dtype))
    return (w1.astype(compute_dtype), w2.astype(compute_dtype), w3p), exitus


def pack_blockdiag_weights(nets, *, compute_dtype=jnp.bfloat16):
    """Fuse N Q-nets sharing the same input into one block-diagonal MLP.

    N=2 fuses the Double-SARSA (a, b) pair into a 128-wide hidden (exactly one
    lane-dense vreg tile; fills a 128x128 MXU).  N=4 additionally fuses the
    target nets into a 256-wide hidden -- recommended on v6e/v7x (256x256 MXU,
    ~same vmatmul cycles, half the launches), NOT on v5e (128x128 MXU).
    """
    n = len(nets)
    initus, hidden = nets[0][0].shape
    exitus = nets[0][2].shape[1]
    # fc1: lane-concatenate -> (initus, n*hidden)
    W1 = jnp.concatenate([w1.astype(compute_dtype) for (w1, _, _) in nets],
                         axis=1)
    # fc2: block-diagonal (n*hidden, n*hidden)
    W2 = jnp.zeros((n * hidden, n * hidden), compute_dtype)
    # fc3: block-diagonal, lane-padded to a multiple of 128.
    out_w = _round_up(n * exitus, LANE)
    W3 = jnp.zeros((n * hidden, out_w), compute_dtype)
    for i, (_, w2, w3) in enumerate(nets):
        W2 = W2.at[i * hidden:(i + 1) * hidden,
                   i * hidden:(i + 1) * hidden].set(w2.astype(compute_dtype))
        W3 = W3.at[i * hidden:(i + 1) * hidden,
                   i * exitus:(i + 1) * exitus].set(w3.astype(compute_dtype))
    return (W1, W2, W3), n, exitus


# ----------------------------------------------------------------------------
# Forward entry points
# ----------------------------------------------------------------------------
def deep_double_sarsa_forward_packed(x, packed, exitus, *, tile_b=2048,
                                     out_dtype=None):
    """Forward with pre-packed single-net weights -> (B, exitus) Q-values."""
    w1, w2, w3 = packed
    flops = 2 * x.shape[0] * (x.shape[1] * w1.shape[1]
                              + w1.shape[1] * w2.shape[1]
                              + w2.shape[1] * exitus)
    out = _mlp_pallas(x, w1, w2, w3, tile_b=tile_b, out_dtype=out_dtype,
                      flops=flops)
    return out[:, :exitus]   # single fused slice of the lane-dense slab


def deep_double_sarsa_forward_blockdiag_packed(x, packed, n_nets, exitus, *,
                                               tile_b=2048, out_dtype=None):
    """Forward with pre-packed block-diagonal N-net weights.
    Returns a tuple of N (B, exitus) Q arrays, one per fused net."""
    w1, w2, w3 = packed
    hidden = w1.shape[1] // n_nets
    # Useful flops only (block-diagonal zero blocks excluded).
    flops = 2 * x.shape[0] * n_nets * (
        x.shape[1] * hidden + hidden * hidden + hidden * exitus)
    out = _mlp_pallas(x, w1, w2, w3, tile_b=tile_b, out_dtype=out_dtype,
                      flops=flops)
    return tuple(out[:, i * exitus:(i + 1) * exitus] for i in range(n_nets))


def deep_double_sarsa_forward(x, w1, w2, w3, *, tile_b=2048,
                              compute_dtype=jnp.bfloat16, out_dtype=None):
    """Forward of one DeepDoubleSarsa net: relu(relu(x@w1)@w2) @ w3.

    Convenience path: packs (casts + lane-pads) per call.  In a training loop,
    pack once per weight update and use deep_double_sarsa_forward_packed.
    """
    packed, exitus = pack_single_weights(w1, w2, w3,
                                         compute_dtype=compute_dtype)
    return deep_double_sarsa_forward_packed(x, packed, exitus, tile_b=tile_b,
                                            out_dtype=out_dtype)


def deep_double_sarsa_forward_pair(x, weights_a, weights_b, *, tile_b=2048,
                                   compute_dtype=jnp.bfloat16, out_dtype=None):
    """Fused forward of BOTH Double-SARSA Q-nets (a, b) in a single launch."""
    packed, n, exitus = pack_blockdiag_weights([weights_a, weights_b],
                                               compute_dtype=compute_dtype)
    return deep_double_sarsa_forward_blockdiag_packed(
        x, packed, n, exitus, tile_b=tile_b, out_dtype=out_dtype)


# ----------------------------------------------------------------------------
# Init / reference
# ----------------------------------------------------------------------------
def init_linear_weight(key, in_features, out_features):
    """torch.nn.Linear default init (Kaiming uniform, bound=1/sqrt(fan_in)),
    stored transposed as (in_features, out_features)."""
    bound = 1.0 / jnp.sqrt(jnp.float32(in_features))
    w = jax.random.uniform(
        key, (out_features, in_features), jnp.float32, minval=-bound,
        maxval=bound)
    return w.T


def _reference(x, w1, w2, w3):
    hp = jax.lax.Precision.HIGHEST
    h = jnp.maximum(jnp.dot(x, w1, precision=hp), 0.0)
    h = jnp.maximum(jnp.dot(h, w2, precision=hp), 0.0)
    return jnp.dot(h, w3, precision=hp)


# TODO(synk): RMSprop optimizer / update() TD-loss backward / save / load /
# perturb are training & IO utilities with no forward-pass Pallas equivalent.
# TODO(synk): fusing the Q[s,a] gather / TD-error consumer into the kernel
# (scalar-prefetched action indices) would remove most remaining output
# writeback; left at the caller level for now.

if __name__ == "__main__":
    batch = 8
    initus = 32   # state/feature dimension
    exitus = 8    # number of actions

    key = jax.random.PRNGKey(0)
    keys = jax.random.split(key, 14)
    kx, kg = keys[0], keys[1]

    def make_net(k3):
        return (init_linear_weight(k3[0], initus, HIDDEN),   # fc1
                init_linear_weight(k3[1], HIDDEN, HIDDEN),    # fc2
                init_linear_weight(k3[2], HIDDEN, exitus))    # fc3

    wa = make_net(keys[2:5])    # online "a" net
    wb = make_net(keys[5:8])    # online "b" net
    wta = make_net(keys[8:11])  # target "a" net
    wtb = make_net(keys[11:14])  # target "b" net

    x = jax.random.normal(kx, (batch, initus), dtype=jnp.float32)
    ref_a = _reference(x, *wa)
    ref_b = _reference(x, *wb)

    # 1) single-net forward, f32 compute: tight check (module semantics).
    q_f32 = jax.block_until_ready(
        deep_double_sarsa_forward(x, *wa, compute_dtype=jnp.float32))
    assert q_f32.shape == (batch, exitus) and q_f32.dtype == jnp.float32
    assert jnp.allclose(q_f32, ref_a, atol=1e-4, rtol=1e-4)

    # 2) single-net forward, bf16 compute + bf16 output (default perf path).
    q_bf16 = jax.block_until_ready(deep_double_sarsa_forward(x, *wa))
    assert q_bf16.shape == (batch, exitus) and q_bf16.dtype == jnp.bfloat16
    assert jnp.allclose(q_bf16.astype(jnp.float32), ref_a, atol=1e-1, rtol=1e-1)

    # 3) fused dual-net forward: both Double-SARSA Q heads in one launch.
    qa, qb = jax.block_until_ready(deep_double_sarsa_forward_pair(x, wa, wb))
    assert qa.shape == (batch, exitus) and qb.shape == (batch, exitus)
    assert jnp.allclose(qa.astype(jnp.float32), ref_a, atol=1e-1, rtol=1e-1)
    assert jnp.allclose(qb.astype(jnp.float32), ref_b, atol=1e-1, rtol=1e-1)

    # 4) 4-net fusion (online a/b + target a/b), f32 compute: tight check.
    #    (Pre-packed once -- the recommended per-weight-update pattern.)
    packed4, n4, ex4 = pack_blockdiag_weights([wa, wb, wta, wtb],
                                              compute_dtype=jnp.float32)
    q4 = jax.block_until_ready(
        deep_double_sarsa_forward_blockdiag_packed(x, packed4, n4, ex4))
    for qi, wi in zip(q4, (wa, wb, wta, wtb)):
        assert qi.shape == (batch, exitus)
        assert jnp.allclose(qi, _reference(x, *wi), atol=1e-4, rtol=1e-4)

    # 5) multi-step batch grid + non-multiple tail (no wrapper padding).
    xg = jax.random.normal(kg, (40, initus), dtype=jnp.float32)
    qg = jax.block_until_ready(
        deep_double_sarsa_forward(xg, *wa, tile_b=16,
                                  compute_dtype=jnp.float32))
    assert qg.shape == (40, exitus)
    assert jnp.allclose(qg, _reference(xg, *wa), atol=1e-4, rtol=1e-4)

    # 6) default bf16 pair path on the same batch: exercises the >=2-grid-step
    #    clamp (v7x megacore) and the masked partial tail block.
    qga, qgb = jax.block_until_ready(deep_double_sarsa_forward_pair(xg, wa, wb))
    assert qga.shape == (40, exitus) and qgb.shape == (40, exitus)
    assert jnp.allclose(qga.astype(jnp.float32), _reference(xg, *wa),
                        atol=1e-1, rtol=1e-1)
    assert jnp.allclose(qgb.astype(jnp.float32), _reference(xg, *wb),
                        atol=1e-1, rtol=1e-1)

    print("KERNEL_OK")
</pallas_src>

<mosaic_0001>
module attributes {stable_mosaic.version = 11 : i64} {
  func.func @_mlp_kernel(%arg0: i32, %arg1: memref<8x32xf32, #tpu.memory_space<vmem>>, %arg2: memref<32x64xf32, #tpu.memory_space<vmem>>, %arg3: memref<64x64xf32, #tpu.memory_space<vmem>>, %arg4: memref<64x128xf32, #tpu.memory_space<vmem>>, %arg5: memref<8x128xf32, #tpu.memory_space<vmem>>) attributes {dimension_semantics = [#tpu.dimension_semantics<parallel>], iteration_bounds = array<i64: 1>, scalar_prefetch = 0 : i64, scratch_operands = 0 : i64, tpu.core_type = #tpu.core_type<tc>, window_params = [{transform_indices = @transform_0, window_bounds = array<i64: 8, 32>}, {pipeline_mode = #tpu.pipeline_mode<synchronous>, transform_indices = @transform_1, window_bounds = array<i64: 32, 64>}, {pipeline_mode = #tpu.pipeline_mode<synchronous>, transform_indices = @transform_2, window_bounds = array<i64: 64, 64>}, {pipeline_mode = #tpu.pipeline_mode<synchronous>, transform_indices = @transform_3, window_bounds = array<i64: 64, 128>}, {transform_indices = @transform_4, window_bounds = array<i64: 8, 128>}]} {
    %c0 = arith.constant 0 : index
    %c0_0 = arith.constant 0 : index
    %0 = vector.load %arg1[%c0, %c0_0] : memref<8x32xf32, #tpu.memory_space<vmem>>, vector<8x32xf32>
    %c0_1 = arith.constant 0 : index
    %c0_2 = arith.constant 0 : index
    %1 = vector.load %arg2[%c0_1, %c0_2] : memref<32x64xf32, #tpu.memory_space<vmem>>, vector<32x64xf32>
    %cst = arith.constant dense<0.000000e+00> : vector<8x64xf32>
    %2 = tpu.matmul %0, %1, %cst {dimension_numbers = #tpu.dot_dimension_numbers<[1], [0], [0], [1], [0, 0, 1, 1], [], []>} : vector<8x32xf32>, vector<32x64xf32>, vector<8x64xf32> -> vector<8x64xf32>
    %cst_3 = arith.constant 0.000000e+00 : f32
    %3 = vector.broadcast %cst_3 : f32 to vector<8x64xf32>
    %4 = arith.maximumf %2, %3 : vector<8x64xf32>
    %c0_4 = arith.constant 0 : index
    %c0_5 = arith.constant 0 : index
    %5 = vector.load %arg3[%c0_4, %c0_5] : memref<64x64xf32, #tpu.memory_space<vmem>>, vector<64x64xf32>
    %cst_6 = arith.constant dense<0.000000e+00> : vector<8x64xf32>
    %6 = tpu.matmul %4, %5, %cst_6 {dimension_numbers = #tpu.dot_dimension_numbers<[1], [0], [0], [1], [0, 0, 1, 1], [], []>} : vector<8x64xf32>, vector<64x64xf32>, vector<8x64xf32> -> vector<8x64xf32>
    %cst_7 = arith.constant 0.000000e+00 : f32
    %7 = vector.broadcast %cst_7 : f32 to vector<8x64xf32>
    %8 = arith.maximumf %6, %7 : vector<8x64xf32>
    %c0_8 = arith.constant 0 : index
    %c0_9 = arith.constant 0 : index
    %9 = vector.load %arg4[%c0_8, %c0_9] : memref<64x128xf32, #tpu.memory_space<vmem>>, vector<64x128xf32>
    %cst_10 = arith.constant dense<0.000000e+00> : vector<8x128xf32>
    %10 = tpu.matmul %8, %9, %cst_10 {dimension_numbers = #tpu.dot_dimension_numbers<[1], [0], [0], [1], [0, 0, 1, 1], [], []>} : vector<8x64xf32>, vector<64x128xf32>, vector<8x128xf32> -> vector<8x128xf32>
    %c0_11 = arith.constant 0 : index
    %c0_12 = arith.constant 0 : index
    %11 = vector.load %arg5[%c0_11, %c0_12] : memref<8x128xf32, #tpu.memory_space<vmem>>, vector<8x128xf32>
    tpu.vector_store %arg5[%c0_11, %c0_12], %10 {strides = array<i32>} : memref<8x128xf32, #tpu.memory_space<vmem>>, vector<8x128xf32>,
    return
  }
  func.func @transform_0(%arg0: i32) -> (i32, i32) {
    %c0_i32 = arith.constant 0 : i32
    %c0_i32_0 = arith.constant 0 : i32
    return %arg0, %c0_i32 : i32, i32
  }
  func.func @transform_1(%arg0: i32) -> (i32, i32) {
    %c0_i32 = arith.constant 0 : i32
    %c0_i32_0 = arith.constant 0 : i32
    %c0_i32_1 = arith.constant 0 : i32
    return %c0_i32, %c0_i32_0 : i32, i32
  }
  func.func @transform_2(%arg0: i32) -> (i32, i32) {
    %c0_i32 = arith.constant 0 : i32
    %c0_i32_0 = arith.constant 0 : i32
    %c0_i32_1 = arith.constant 0 : i32
    return %c0_i32, %c0_i32_0 : i32, i32
  }
  func.func @transform_3(%arg0: i32) -> (i32, i32) {
    %c0_i32 = arith.constant 0 : i32
    %c0_i32_0 = arith.constant 0 : i32
    %c0_i32_1 = arith.constant 0 : i32
    return %c0_i32, %c0_i32_0 : i32, i32
  }
  func.func @transform_4(%arg0: i32) -> (i32, i32) {
    %c0_i32 = arith.constant 0 : i32
    %c0_i32_0 = arith.constant 0 : i32
    return %arg0, %c0_i32 : i32, i32
  }
}

</mosaic_0001>

<bundles_post_ra>
// kernel: tpu_custom_call.1
= control target key start
LH: loop header
LB: loop body
LE: loop exit
PB: predicated region body
PF: predicated region fallthrough
CT: control target
= control target key end

     0   :  { %9 = vsyncpa [#allocation3], 0  ;;  %s673_s0 = inlined_call_operand.hbm [shape: f32[8,32], index: 0, kind: input, shape index: {}]   ;;  %s674_s1 = inlined_call_operand.hbm [shape: f32[32,64], index: 1, kind: input, shape index: {}]   ;;  %s675_s2 = inlined_call_operand.hbm [shape: f32[64,64], index: 2, kind: input, shape index: {}]   ;;  %s676_s3 = inlined_call_operand.hbm [shape: f32[64,128], index: 3, kind: input, shape index: {}]   ;;  %s677_s4 = inlined_call_operand.hbm [shape: f32[8,128], index: 4, kind: output, shape index: {}]  }
   0x1   :  { %10 = vsyncpa [#allocation6], 0 }
   0x2   :  { %11 = vsyncpa [#allocation9], 0 }
   0x3   :  { %12 = vsyncpa [#allocation4], 0  ;;  %s566_s15 = smov [#allocation5]   ;;  %s448_s19 = scalar_lea.hbm %s674_s1, 512 }
   0x4   :  { %s28_s16 = sshll.u32 %s566_s15, 4  ;;  %p449_p0 = scmp.ne.s32.totalorder %s674_s1, %s448_s19  ;;  %s29_s16 = int_to_ptr.vmem [resolvable:$true] %s28_s16 }
   0x5   :  { %p452_p1 = scmp.lt.u32.totalorder %s448_s19, %s674_s1 }
   0x7   :  { %p454_p2 = pnand %p452_p1, %p449_p0 }
   0x9   :  { %457 = shalt.err (!%p454_p2)
}
   0xa   :  { %s458_s24 = scalar_lea.vmem %s29_s16, 512  ;;  %p463_p4 = scmp.lt.s32.totalorder %s29_s16, %s29_s16 }
   0xb   :  { %p459_p3 = scmp.ne.s32.totalorder %s29_s16, %s458_s24  ;;  %p464_p5 = scmp.lt.s32.totalorder %s458_s24, %s458_s24 }
   0xd   :  { %p465_p6 = por %p464_p5, %p463_p4 }
   0xf   :  { %p466_p7 = pnand %p465_p6, %p459_p3 }
  0x11   :  { %469 = shalt.err (!%p466_p7)
}
  0x12   :  { %s567_s25 = smov 128   ;;  %s568_s26 = smov 8  }
  0x13   :  { %34 = dma.hbm_to_vmem [thread:$0]  %s674_s1, 512, %s29_s16, [#allocation6], %s567_s25, %s567_s25, %s568_s26  }
  0x14   :  { %s569_s29 = smov [#allocation2]   ;;  %s570_s5 = smov [#allocation7]  }
  0x15   :  { %s19_s30 = sshll.u32 %s569_s29, 4  ;;  %s40_s6 = sshll.u32 %s570_s5, 4  ;;  %s20_s30 = int_to_ptr.vmem [resolvable:$true] %s19_s30  ;;  %s41_s6 = int_to_ptr.vmem [resolvable:$true] %s40_s6 }
  0x16   :  { %s470_s9 = scalar_lea.hbm %s673_s0, 128 }
  0x17   :  { %p471_p8 = scmp.ne.s32.totalorder %s673_s0, %s470_s9  ;;  %p474_p9 = scmp.lt.u32.totalorder %s470_s9, %s673_s0 }
  0x19   :  { %p476_p10 = pnand %p474_p9, %p471_p8 }
  0x1b   :  { %479 = shalt.err (!%p476_p10)
}
  0x1c   :  { %s480_s1 = scalar_lea.vmem %s20_s30, 128  ;;  %p485_p12 = scmp.lt.s32.totalorder %s20_s30, %s20_s30 }
  0x1d   :  { %p481_p11 = scmp.ne.s32.totalorder %s20_s30, %s480_s1  ;;  %p486_p13 = scmp.lt.s32.totalorder %s480_s1, %s480_s1 }
  0x1f   :  { %p487_p0 = por %p486_p13, %p485_p12 }
  0x21   :  { %p488_p1 = pnand %p487_p0, %p481_p11 }
  0x23   :  { %491 = shalt.err (!%p488_p1)
}
  0x24   :  { %22 = dma.hbm_to_vmem [thread:$0]  %s673_s0, 128, %s20_s30, [#allocation3]  }
  0x25   :  { %s492_s18 = scalar_lea.hbm %s675_s2, 1024 }
  0x26   :  { %p493_p2 = scmp.ne.s32.totalorder %s675_s2, %s492_s18  ;;  %p496_p3 = scmp.lt.u32.totalorder %s492_s18, %s675_s2 }
  0x28   :  { %p498_p4 = pnand %p496_p3, %p493_p2 }
  0x2a   :  { %501 = shalt.err (!%p498_p4)
}
  0x2b   :  { %s502_s23 = scalar_lea.vmem %s41_s6, 1024  ;;  %p507_p6 = scmp.lt.s32.totalorder %s41_s6, %s41_s6 }
  0x2c   :  { %p503_p5 = scmp.ne.s32.totalorder %s41_s6, %s502_s23  ;;  %p508_p7 = scmp.lt.s32.totalorder %s502_s23, %s502_s23 }
  0x2e   :  { %p509_p8 = por %p508_p7, %p507_p6 }
  0x30   :  { %p510_p9 = pnand %p509_p8, %p503_p5 }
  0x32   :  { %513 = shalt.err (!%p510_p9)
}
  0x33   :  { %46 = dma.hbm_to_vmem [thread:$0]  %s675_s2, 1024, %s41_s6, [#allocation6], %s567_s25, %s567_s25, %s568_s26  }
  0x34   :  { %s571_s27 = smov [#allocation8]   ;;  %s514_s5 = scalar_lea.hbm %s676_s3, 1024 }
  0x35   :  { %s52_s28 = sshll.u32 %s571_s27, 4  ;;  %p515_p10 = scmp.ne.s32.totalorder %s676_s3, %s514_s5  ;;  %s53_s28 = int_to_ptr.vmem [resolvable:$true] %s52_s28 }
  0x36   :  { %p518_p11 = scmp.lt.u32.totalorder %s514_s5, %s676_s3 }
  0x38   :  { %p520_p12 = pnand %p518_p11, %p515_p10 }
  0x3a   :  { %523 = shalt.err (!%p520_p12)
}
  0x3b   :  { %s524_s11 = scalar_lea.vmem %s53_s28, 1024  ;;  %p529_p0 = scmp.lt.s32.totalorder %s53_s28, %s53_s28 }
  0x3c   :  { %p525_p13 = scmp.ne.s32.totalorder %s53_s28, %s524_s11  ;;  %p530_p1 = scmp.lt.s32.totalorder %s524_s11, %s524_s11 }
  0x3e   :  { %p531_p2 = por %p530_p1, %p529_p0 }
  0x40   :  { %p532_p3 = pnand %p531_p2, %p525_p13 }
  0x42   :  { %535 = shalt.err (!%p532_p3)
}
  0x43   :  { %58 = dma.hbm_to_vmem [thread:$0]  %s676_s3, 1024, %s53_s28, [#allocation9], %s567_s25, %s567_s25, %s568_s26  }
  0x44   :  { %558 = dma.done.wait [#allocation3], 128  }
  0x45   :  { %559 = vsyncadd [#allocation3], 4294967168 }
  0x46   :  { %560 = dma.done.wait [#allocation6], 1536  }
  0x47   :  { %561 = vsyncadd [#allocation6], 4294965760 }
  0x48   :  { %562 = dma.done.wait [#allocation9], 1024  }
  0x49   :  { %563 = vsyncadd [#allocation9], 4294966272  ;;  %v572_v0 = vmov 0.0|0.0   ;;  %vm573_vm0 = vmmov 0   ;;  %v574_v1 = vmov 0.0   ;;  %v72_v2 = vld [vmem:[#allocation5] sm:$0xff] }
  0x4a   :  { %408 = vmatprep.subr.bf16.mxu0 %v572_v0  ;;  %367 = vmatprep.mubr.msk.f32.mxu0 %vm573_vm0, %v574_v1  ;;  %v73_v3 = vld [vmem:[#allocation5 + $0x8] sm:$0xff]  ;;  %v74_v4 = vld [vmem:[#allocation5 + $0x10] sm:$0xff]  ;;  %v75_v6 = vld [vmem:[#allocation5 + $0x18] sm:$0xff]  ;;  %vm76_vm1 = vcmask 261120   ;;  %vm159_vm2 = vcmask 523264   ;;  %s575_s3 = smov [#allocation10]  }
  0x4b   :  { %414 = vmatprep.subr.bf16.mxu1 %v572_v0  ;;  %386 = vmatprep.mubr.msk.f32.mxu1 %vm573_vm0, %v574_v1  ;;  %v409_v5 = vpack.c.bf16 %v73_v3, %v72_v2  ;;  %v151_v7 = vld [vmem:[#allocation7] sm:$0xff]  ;;  %v152_v8 = vld [vmem:[#allocation7 + $0x8] sm:$0xff]  ;;  %v153_v9 = vld [vmem:[#allocation7 + $0x10] sm:$0xff]  ;;  %v412_v11 = vpack.c.bf16 %v75_v6, %v74_v4  ;;  %s322_s25 = sshll.u32 %s575_s3, 4  ;;  %s323_s25 = int_to_ptr.vmem [resolvable:$true] %s322_s25 }
  0x4c   :  { %v154_v10 = vld [vmem:[#allocation7 + $0x18] sm:$0xff]  ;;  %v415_v12 = vpack.c.bf16 %v152_v8, %v151_v7  ;;  %v155_v14 = vld [vmem:[#allocation7 + $0x20] sm:$0xff]  ;;  %v156_v15 = vld [vmem:[#allocation7 + $0x28] sm:$0xff]  ;;  %s536_s26 = scalar_lea.vmem %s323_s25, 128  ;;  %p541_p5 = scmp.lt.s32.totalorder %s323_s25, %s323_s25 }
  0x4d   :  { %410 = vmatpush3.bf16.msra.mxu0 %v409_v5  ;;  %v418_v13 = vpack.c.bf16 %v154_v10, %v153_v9  ;;  %v71_v16 = vld [vmem:[#allocation2] sm:$0xff]  ;;  %v421_v17 = vpack.c.bf16 %v156_v15, %v155_v14  ;;  %v157_v18 = vld [vmem:[#allocation7 + $0x30] sm:$0xff]  ;;  %v234_v21 = vld [vmem:[#allocation8] sm:$0xff]  ;;  %p537_p4 = scmp.ne.s32.totalorder %s323_s25, %s536_s26  ;;  %p542_p6 = scmp.lt.s32.totalorder %s536_s26, %s536_s26 }
  0x4e   :  { %411 = vmatprep.subr.bf16.mxu0 %v572_v0  ;;  %416 = vmatpush3.bf16.msra.mxu1 %v415_v12  ;;  %v158_v19 = vld [vmem:[#allocation7 + $0x38] sm:$0xff]  ;;  %v235_v22 = vld [vmem:[#allocation8 + $0x8] sm:$0xff]  ;;  %v236_v23 = vld [vmem:[#allocation8 + $0x10] sm:$0xff] }
  0x4f   :  { %417 = vmatprep.subr.bf16.mxu1 %v572_v0  ;;  %v424_v20 = vpack.c.bf16 %v158_v19, %v157_v18  ;;  %v427_v24 = vpack.c.bf16 %v235_v22, %v234_v21  ;;  %v237_v25 = vld [vmem:[#allocation8 + $0x18] sm:$0xff]  ;;  %v238_v27 = vld [vmem:[#allocation8 + $0x20] sm:$0xff]  ;;  %v239_v28 = vld [vmem:[#allocation8 + $0x28] sm:$0xff]  ;;  %p543_p7 = por %p542_p6, %p541_p5 }
  0x50   :  { %v430_v26 = vpack.c.bf16 %v237_v25, %v236_v23  ;;  %v433_v29 = vpack.c.bf16 %v239_v28, %v238_v27  ;;  %v240_v33 = vld [vmem:[#allocation8 + $0x30] sm:$0xff]  ;;  %v241_v34 = vld [vmem:[#allocation8 + $0x38] sm:$0xff] }
  0x51   :  { %413 = vmatpush3.bf16.msra.mxu0 %v412_v11  ;;  %v436_v35 = vpack.c.bf16 %v241_v34, %v240_v33  ;;  %p544_p8 = pnand %p543_p7, %p537_p4 }
  0x52   :  { %426 = vmatprep.subr.bf16.mxu0 %v572_v0  ;;  %419 = vmatpush3.bf16.msra.mxu1 %v418_v13 }
  0x53   :  { %420 = vmatprep.subr.bf16.mxu1 %v572_v0 }
  0x54   :  { %368 = vmatmul.mubr.msk.f32.vlgmr.msra.gmra.mrb[0].mxu0 %vm76_vm1, %v71_v16 }
  0x55   :  { %405 = vmatprep.mubr.msk.f32.mxu0 %vm573_vm0, %v574_v1  ;;  %428 = vmatpush3.bf16.msra.mxu0 %v427_v24 }
  0x56   :  { %422 = vmatpush3.bf16.msra.mxu1 %v421_v17  ;;  %429 = vmatprep.subr.bf16.mxu0 %v572_v0 }
  0x57   :  { %423 = vmatprep.subr.bf16.mxu1 %v572_v0 }
  0x59   :  { %431 = vmatpush3.bf16.msra.mxu0 %v430_v26 }
  0x5a   :  { %425 = vmatpush3.bf16.msra.mxu1 %v424_v20  ;;  %432 = vmatprep.subr.bf16.mxu0 %v572_v0 }
  0x5d   :  { %434 = vmatpush3.bf16.msra.mxu0 %v433_v29 }
  0x5e   :  { %435 = vmatprep.subr.bf16.mxu0 %v572_v0 }
  0x61   :  { %437 = vmatpush3.bf16.msra.mxu0 %v436_v35 }
 0x127   :  { %v146_v30 = vpop.f32.mrb[0].mxu0 }
 0x128   :  { %v150_v31 = vmax.f32 %v146_v30, 0.0  ;;  %v369_v32 = vpop.f32.mrb[1].mxu0 }
 0x12a   :  { %387 = vmatmul.mubr.msk.f32.vlgmr.msra.gmra.mrb[0].mxu1 %vm159_vm2, %v150_v31 }
 0x1fd   :  { %v229_v36 = vpop.f32.mrb[0].mxu1 }
 0x1fe   :  { %v233_v37 = vmax.f32 %v229_v36, 0.0  ;;  %v388_v38 = vpop.f32.mrb[1].mxu1 }
 0x200   :  { %406 = vmatmul.mubr.msk.f32.vlgmr.msra.gmra.mrb[2].mxu0 %vm159_vm2, %v233_v37 }
 0x2d3   :  { %v311_v39 = vpop.f32.mrb[2].mxu0 }
 0x2d4   :  { %315 = vst [vmem:[#allocation10] sm:$0xff] %v311_v39  ;;  %v407_v40 = vpop.f32.mrb[3].mxu0 }
 0x2d5   :  { %547 = shalt.err (!%p544_p8)
}
 0x2d6   :  { %s548_s1 = scalar_lea.hbm %s677_s4, 128 }
 0x2d7   :  { %p549_p9 = scmp.ne.s32.totalorder %s677_s4, %s548_s1  ;;  %p552_p10 = scmp.lt.u32.totalorder %s548_s1, %s677_s4 }
 0x2d9   :  { %p554_p11 = pnand %p552_p10, %p549_p9 }
 0x2db   :  { %557 = shalt.err (!%p554_p11)
}
 0x2dc   :  { %325 = dma.vmem_to_hbm [thread:$0]  %s323_s25, 128, %s677_s4, [#allocation4]  }
 0x2dd   :  { %564 = dma.done.wait [#allocation4], 128  }
 0x2de   :  { %565 = vsyncadd [#allocation4], 4294967168 }
 0x2df   :  { %329 = vsyncpa [#allocation3], 1 }
 0x2e0   :  { %330 = vsyncpa [#allocation6], 1 }
 0x2e1   :  { %331 = vsyncpa [#allocation9], 1 }
 0x2e2   :  { %332 = vsyncpa [#allocation4], 1 }

</bundles_post_ra>
